<compile_context>
chip_gen: v5e
topology: v5e:2x2
jax: 0.10.0
libtpu: 0.0.40
codegen_flags: <defaults>
</compile_context>

<pallas_src>
import jax
import jax.numpy as jnp
from jax.experimental import pallas as pl
from jax.experimental.pallas import tpu as pltpu


# ----------------------------------------------------------------------------
# Kernels
# ----------------------------------------------------------------------------

def _copy_tile_kernel(x_ref, o_ref):
    # Both refs are (TR, TL) views at identical (ri, li) block offsets.
    # Full-tile, lane-dense copy; Pallas clamps the ragged input read at the
    # array bound and masks the ragged output writeback automatically.
    o_ref[...] = x_ref[...]


def _chomp_small_kernel(x_ref, o_ref):
    # Fallback for L_out < 128: one sub-vreg-wide tile per row-tile; the
    # in-kernel slice is unavoidable and cheap here.
    o_ref[...] = x_ref[:, : o_ref.shape[-1]]


# ----------------------------------------------------------------------------
# Wrapper
# ----------------------------------------------------------------------------

def chomp1d(x: jax.Array, chomp_size: int) -> jax.Array:
    """Pallas equivalent of Chomp1d.forward: x[:, :, :-chomp_size].contiguous()."""
    assert chomp_size > 0, "chomp_size must be positive (PyTorch :-0 edge not supported)"
    n, c, l = x.shape
    l_out = l - chomp_size
    assert l_out > 0, "chomp_size must be smaller than the length axis"

    rows = n * c
    x2 = x.reshape(rows, l)  # free, contiguous reshape — collapses N and C
    itemsize = jnp.dtype(x.dtype).itemsize

    # Advisory: pure memory traffic (read l_out cols per row + write them back).
    cost = pl.CostEstimate(
        flops=0,
        transcendentals=0,
        bytes_accessed=2 * rows * l_out * itemsize,
    )

    if l_out >= 128:
        # Fast path: lane-dense tiled copy over collapsed rows.
        #   TL: multiple of 128 (unmasked vst on interior tiles), capped at 4096.
        #   TR: sized so one buffer carries ~8 MiB => 4 buffers ~32 MiB VMEM,
        #       safe even on v7x (64 MiB physical).
        target_tile_bytes = 8 * 1024 * 1024
        tl = min(4096, (l_out // 128) * 128)
        max_tr = max(8, ((target_tile_bytes // (tl * itemsize)) // 8) * 8)
        tr = rows if rows <= max_tr else max_tr  # full-dim block always legal

        grid = (pl.cdiv(rows, tr), pl.cdiv(l_out, tl))
        grid_spec = pltpu.PrefetchScalarGridSpec(
            num_scalar_prefetch=0,
            grid=grid,
            in_specs=[
                # Same index_map as the output: the chomp only drops the tail.
                pl.BlockSpec((tr, tl), lambda ri, li: (ri, li)),
            ],
            out_specs=pl.BlockSpec((tr, tl), lambda ri, li: (ri, li)),
        )
        kernel = _copy_tile_kernel
        dim_sem = ("parallel", "parallel")
        vmem_limit = 48 * 1024 * 1024
    else:
        # Tiny-length fallback: one block per row-tile covering the full
        # (short) length axis of input and output.
        target_tile_bytes = 4 * 1024 * 1024
        max_tr = max(8, ((target_tile_bytes // (l * itemsize)) // 8) * 8)
        tr = rows if rows <= max_tr else max_tr

        grid = (pl.cdiv(rows, tr),)
        grid_spec = pltpu.PrefetchScalarGridSpec(
            num_scalar_prefetch=0,
            grid=grid,
            in_specs=[
                pl.BlockSpec((tr, l), lambda ri: (ri, 0)),
            ],
            out_specs=pl.BlockSpec((tr, l_out), lambda ri: (ri, 0)),
        )
        kernel = _chomp_small_kernel
        dim_sem = ("parallel",)
        vmem_limit = 32 * 1024 * 1024
        # TODO(synk): if this short-sequence path is ever hot with c >= 128,
        # present channels on the lane axis to avoid masked vst.msk stores.

    y2 = pl.pallas_call(
        kernel,
        out_shape=jax.ShapeDtypeStruct((rows, l_out), x.dtype),
        grid_spec=grid_spec,
        compiler_params=pltpu.CompilerParams(
            dimension_semantics=dim_sem,
            vmem_limit_bytes=vmem_limit,
        ),
        cost_estimate=cost,
    )(x2)

    return y2.reshape(n, c, l_out)


if __name__ == "__main__":
    key = jax.random.PRNGKey(0)

    # Case 1: small NCL input consistent with a TCN-style Conv1d output
    # (exercises the L_out < 128 fallback path).
    chomp_size = 2
    batch, channels, length = 2, 4, 16
    x_small = jax.random.normal(key, (batch, channels, length), dtype=jnp.float32)
    y_small = jax.block_until_ready(chomp1d(x_small, chomp_size))
    assert y_small.shape == (batch, channels, length - chomp_size)
    assert jnp.array_equal(y_small, x_small[:, :, :-chomp_size])

    # Case 2: exercises the lane-dense fast path with a ragged last length
    # tile (l_out = 200 -> TL = 128, last tile masked; input read clamped).
    b2, c2, l2, chomp2 = 2, 16, 205, 5
    x_big = jax.random.normal(jax.random.PRNGKey(0), (b2, c2, l2), dtype=jnp.float32)
    y_big = jax.block_until_ready(chomp1d(x_big, chomp2))
    assert y_big.shape == (b2, c2, l2 - chomp2)
    assert jnp.array_equal(y_big, x_big[:, :, :-chomp2])

    print("KERNEL_OK")
</pallas_src>

<mosaic_0001>
module attributes {stable_mosaic.version = 11 : i64} {
  func.func @_chomp_small_kernel(%arg0: i32, %arg1: memref<8x16xf32, #tpu.memory_space<vmem>>, %arg2: memref<8x14xf32, #tpu.memory_space<vmem>>) attributes {dimension_semantics = [#tpu.dimension_semantics<parallel>], iteration_bounds = array<i64: 1>, scalar_prefetch = 0 : i64, scratch_operands = 0 : i64, tpu.core_type = #tpu.core_type<tc>, window_params = [{transform_indices = @transform_0, window_bounds = array<i64: 8, 16>}, {transform_indices = @transform_1, window_bounds = array<i64: 8, 14>}]} {
    %c0 = arith.constant 0 : index
    %c0_0 = arith.constant 0 : index
    %0 = vector.load %arg1[%c0, %c0_0] : memref<8x16xf32, #tpu.memory_space<vmem>>, vector<8x14xf32>
    %c0_1 = arith.constant 0 : index
    %c0_2 = arith.constant 0 : index
    %1 = vector.load %arg2[%c0_1, %c0_2] : memref<8x14xf32, #tpu.memory_space<vmem>>, vector<8x14xf32>
    tpu.vector_store %arg2[%c0_1, %c0_2], %0 {strides = array<i32>} : memref<8x14xf32, #tpu.memory_space<vmem>>, vector<8x14xf32>,
    return
  }
  func.func @transform_0(%arg0: i32) -> (i32, i32) {
    %c0_i32 = arith.constant 0 : i32
    %c0_i32_0 = arith.constant 0 : i32
    return %arg0, %c0_i32 : i32, i32
  }
  func.func @transform_1(%arg0: i32) -> (i32, i32) {
    %c0_i32 = arith.constant 0 : i32
    %c0_i32_0 = arith.constant 0 : i32
    return %arg0, %c0_i32 : i32, i32
  }
}

</mosaic_0001>

<bundles_post_ra>
// kernel: tpu_custom_call.1
= control target key start
LH: loop header
LB: loop body
LE: loop exit
PB: predicated region body
PF: predicated region fallthrough
CT: control target
= control target key end

     0   :  { %6 = vsyncpa [#allocation3], 0  ;;  %s115_s0 = inlined_call_operand.hbm [shape: f32[8,16], index: 0, kind: input, shape index: {}]   ;;  %s116_s1 = inlined_call_operand.hbm [shape: f32[8,14], index: 1, kind: output, shape index: {}]  }
   0x1   :  { %7 = vsyncpa [#allocation4], 0  ;;  %s13_s8 = sshll.u32 %s115_s0, 4  ;;  %s97_s9 = smov [#allocation2]   ;;  %s14_s8 = int_to_ptr.hbm [resolvable:$true] %s13_s8 }
   0x2   :  { %s15_s10 = sshll.u32 %s97_s9, 4  ;;  %s16_s10 = int_to_ptr.vmem [resolvable:$true] %s15_s10 }
   0x3   :  { %18 = dma.hbm_to_vmem [thread:$0]  %s14_s8, 128, %s16_s10, [#allocation3]  }
   0x4   :  { %93 = dma.done.wait [#allocation3], 128  }
   0x5   :  { %94 = vsyncadd [#allocation3], 4294967168  ;;  %s98_s11 = smov [#allocation5]   ;;  %s33_s15 = sshll.u32 %s116_s1, 4  ;;  %vm24_vm0 = vcmask 113664   ;;  %v23_v0 = vld [vmem:[#allocation2] sm:$0xff]  ;;  %s34_s15 = int_to_ptr.hbm [resolvable:$true] %s33_s15 }
   0x6   :  { %s31_s12 = sshll.u32 %s98_s11, 4  ;;  %25 = vst.msk [vmem:[#allocation5] sm:$0xff] %vm24_vm0, %v23_v0  ;;  %s32_s12 = int_to_ptr.vmem [resolvable:$true] %s31_s12 }
   0x7   :  { %36 = dma.vmem_to_hbm [thread:$0]  %s32_s12, 128, %s34_s15, [#allocation4]  }
   0x8   :  { %95 = dma.done.wait [#allocation4], 128  }
   0x9   :  { %96 = vsyncadd [#allocation4], 4294967168 }
   0xa   :  { %41 = vsyncpa [#allocation3], 1 }
   0xb   :  { %42 = vsyncpa [#allocation4], 1 }

</bundles_post_ra>
